<compile_context>
chip_gen: v5e
topology: v5e:2x2
jax: 0.10.0
libtpu: 0.0.40
codegen_flags: <defaults>
</compile_context>

<pallas_src>
import functools
import math

import jax
import jax.numpy as jnp
from jax import lax
from jax.experimental import pallas as pl
from jax.experimental.pallas import tpu as pltpu


# ----------------------------------------------------------------------------
# Shared pallas_call conveniences.
# ----------------------------------------------------------------------------
def _vmem_limit_bytes():
    """Generation-aware scoped-VMEM limit (~3/4 of physical VMEM)."""
    default = 32 * 1024 * 1024
    try:
        info = pltpu.get_tpu_info()
        cap = int(getattr(info, "vmem_capacity_bytes", 0) or 0)
        if cap > 0:
            return max(default, (3 * cap) // 4)
    except Exception:  # best-effort hardware query; fall back to a safe value
        pass
    return default


_VMEM_LIMIT = _vmem_limit_bytes()


def _compiler_params(dimension_semantics):
    return pltpu.CompilerParams(dimension_semantics=dimension_semantics,
                                vmem_limit_bytes=_VMEM_LIMIT)


def _pick_tile(dim, cap, align):
    """Largest tile <= cap that divides dim and is a multiple of `align`.
    Returns None when no such divisor exists (caller pads the operand up)."""
    if dim <= cap:
        return dim
    for t in range(cap - cap % align, align - 1, -align):
        if dim % t == 0:
            return t
    return None


def _pad_axis(a, axis, multiple):
    pad = (-a.shape[axis]) % multiple
    if pad == 0:
        return a
    widths = [(0, 0)] * a.ndim
    widths[axis] = (0, pad)
    return jnp.pad(a, widths)


# ----------------------------------------------------------------------------
# Pallas kernel 1: tiled, pipelined  Y = X @ W + b  (+ optional ReLU).
# ----------------------------------------------------------------------------
def _matmul_bias_kernel(x_ref, w_ref, b_ref, o_ref, acc_ref, *, relu):
    k = pl.program_id(2)
    prod = jnp.dot(x_ref[...], w_ref[...], preferred_element_type=jnp.float32)

    @pl.when(k == 0)
    def _init():                       # direct write: no zero-init pass
        acc_ref[...] = prod

    @pl.when(k > 0)
    def _accumulate():
        acc_ref[...] += prod

    @pl.when(k == pl.num_programs(2) - 1)
    def _finalize():
        out = acc_ref[...] + b_ref[...]
        if relu:
            out = jnp.maximum(out, 0.0)
        o_ref[...] = out.astype(o_ref.dtype)


def pallas_linear(x, w, b, relu=False, out_dtype=jnp.float32):
    """y = x @ w + b (+ ReLU).  bf16 operands on the MXU, f32 accumulation."""
    M, K = x.shape
    K2, N = w.shape
    assert K == K2
    x = x.astype(jnp.bfloat16)
    w = w.astype(jnp.bfloat16)
    b2 = b.reshape(1, N).astype(jnp.float32)

    # Tile caps sized for >=256-wide MXU pushes; small dims use a full-extent
    # block (no padding).  Awkward large dims fall back to a zero-pad-up.
    tm = _pick_tile(M, 512, 16)        # 16: bf16 sublane packing
    tn = _pick_tile(N, 512, 128)
    tk = _pick_tile(K, 2048, 256)
    if tm is None:
        tm = 256
        x = _pad_axis(x, 0, tm)
    if tk is None:
        tk = 512
        x = _pad_axis(x, 1, tk)
        w = _pad_axis(w, 0, tk)
    if tn is None:
        tn = 256
        w = _pad_axis(w, 1, tn)
        b2 = _pad_axis(b2, 1, tn)
    Mp, Kp = x.shape
    Np = w.shape[1]
    grid = (Mp // tm, Np // tn, Kp // tk)

    out_bytes = jnp.dtype(out_dtype).itemsize
    cost = pl.CostEstimate(
        flops=2 * Mp * Np * Kp, transcendentals=0,
        bytes_accessed=2 * Mp * Kp + 2 * Kp * Np + out_bytes * Mp * Np + 4 * Np)

    out = pl.pallas_call(
        functools.partial(_matmul_bias_kernel, relu=relu),
        out_shape=jax.ShapeDtypeStruct((Mp, Np), out_dtype),
        grid=grid,
        in_specs=[
            pl.BlockSpec((tm, tk), lambda i, j, k: (i, k)),
            pl.BlockSpec((tk, tn), lambda i, j, k: (k, j)),
            pl.BlockSpec((1, tn), lambda i, j, k: (0, j)),
        ],
        out_specs=pl.BlockSpec((tm, tn), lambda i, j, k: (i, j)),
        scratch_shapes=[pltpu.VMEM((tm, tn), jnp.float32)],
        compiler_params=_compiler_params(("parallel", "parallel", "arbitrary")),
        cost_estimate=cost,
    )(x, w, b2)
    if (Mp, Np) != (M, N):
        out = out[:M, :N]
    return out


# ----------------------------------------------------------------------------
# Convolution helpers (NHWC, lane-dense channel-last slabs).
# ----------------------------------------------------------------------------
def _conv_w_mat(w):
    """(Cout, Cin, kh, kw) torch layout -> (kh*kw*Cin, Cout) matmul layout."""
    Cout, Cin, kh, kw = w.shape
    return jnp.transpose(w, (2, 3, 1, 0)).reshape(kh * kw * Cin, Cout)


def _im2col_nhwc(x, kh, kw, stride, pad):
    N, H, W, C = x.shape
    xp = jnp.pad(x, ((0, 0), (pad, pad), (pad, pad), (0, 0)))
    Ho = (H + 2 * pad - kh) // stride + 1
    Wo = (W + 2 * pad - kw) // stride + 1
    taps = [xp[:, i:i + stride * Ho:stride, j:j + stride * Wo:stride, :]
            for i in range(kh) for j in range(kw)]
    col = jnp.concatenate(taps, axis=-1)                 # (N, Ho, Wo, kh*kw*C)
    return col.reshape(N * Ho * Wo, kh * kw * C), Ho, Wo


def conv2d_im2col(x_nhwc, wmat, b, kh, kw, stride, pad, relu, out_dtype):
    # TODO(synk): generic strided conv keeps a JAX-side im2col; in this model
    # only the cheap 3-channel backbone conv (K = 27) goes through this path.
    N = x_nhwc.shape[0]
    col, Ho, Wo = _im2col_nhwc(x_nhwc.astype(jnp.bfloat16), kh, kw, stride, pad)
    y = pallas_linear(col, wmat, b, relu=relu, out_dtype=out_dtype)
    return y.reshape(N, Ho, Wo, -1)


# ----------------------------------------------------------------------------
# Pallas kernel 2: fused RPN block.
#   3x3 / stride-1 / pad-1 conv (+ReLU), all 9 taps accumulated in-kernel on a
#   flattened padded slab, then the fused 1x1 score+delta heads applied while
#   the hidden tile is still VMEM/vreg resident.
# ----------------------------------------------------------------------------
def _rpn_conv_head_kernel(xs_ref, wc_ref, bc_ref, wh_ref, bh_ref, o_ref, *,
                          wpad, cin):
    # xs_ref: ((H+3)*(W+2), Cin)  f32 zero-padded feature slab (one image)
    # wc_ref: (9*Cin, RC)         tap-major 3x3 conv weights, bf16
    # bc_ref: (1, RC)             f32
    # wh_ref: (RC, 5A)            fused 1x1 score+delta head weights, bf16
    # bh_ref: (1, 5A)             f32
    # o_ref : (H*(W+2), 5A)       f32; columns w' >= W of each h-row are junk
    L = o_ref.shape[0]
    acc = None
    for di in range(3):
        for dj in range(3):
            off = di * wpad + dj                         # static tap offset
            xt = xs_ref[off:off + L, :].astype(jnp.bfloat16)
            wt = wc_ref[(di * 3 + dj) * cin:(di * 3 + dj + 1) * cin, :]
            p = jnp.dot(xt, wt, preferred_element_type=jnp.float32)
            acc = p if acc is None else acc + p
    hidden = jnp.maximum(acc + bc_ref[...], 0.0).astype(jnp.bfloat16)
    sd = jnp.dot(hidden, wh_ref[...], preferred_element_type=jnp.float32)
    o_ref[...] = (sd + bh_ref[...]).astype(o_ref.dtype)


def rpn_conv_and_heads(feature_nhwc, conv_wmat, conv_b, head_wmat, head_b):
    """3x3 stride-1 pad-1 conv + ReLU + fused 1x1 score/delta heads."""
    N, H, W, C = feature_nhwc.shape
    RC = conv_wmat.shape[1]
    Ch = head_wmat.shape[1]
    wpad = W + 2
    rows_in = (H + 3) * wpad           # +1 top pad, +2 bottom (tap overrun)
    rows_out = H * wpad                # "wide" rows: 2 junk columns per h-row

    # Per-image VMEM working set: f32 slab (double buffered), weights, output
    # (double buffered), hidden + tap temporaries.
    ws = (2 * rows_in * C * 4 + 9 * C * RC * 2 + RC * Ch * 2
          + 2 * rows_out * Ch * 4 + rows_out * (RC + 2 * C) * 4)
    if ws > _VMEM_LIMIT // 2:
        # TODO(synk): halo row-block tiling instead of the im2col fallback for
        # feature maps whose padded slab does not fit in VMEM.
        hidden = conv2d_im2col(feature_nhwc, conv_wmat, conv_b, 3, 3, 1, 1,
                               relu=True, out_dtype=jnp.bfloat16)
        sd = pallas_linear(hidden.reshape(N * H * W, RC), head_wmat, head_b)
        return sd.reshape(N, H, W, Ch)

    # pad: 1 row top, 2 rows bottom (bottom extra only feeds discarded cols),
    # 1 col left, 1 col right; keep f32 so odd-row tap slices stay on plain
    # 32-bit sublane shifts.
    xp = jnp.pad(feature_nhwc.astype(jnp.float32),
                 ((0, 0), (1, 2), (1, 1), (0, 0)))
    xs = xp.reshape(N, rows_in, C)
    bc = conv_b.reshape(1, RC).astype(jnp.float32)
    bh = head_b.reshape(1, Ch).astype(jnp.float32)

    cost = pl.CostEstimate(
        flops=2 * N * rows_out * (9 * C + Ch) * RC,
        transcendentals=0,
        bytes_accessed=xs.size * 4 + 9 * C * RC * 2 + RC * Ch * 2
        + N * rows_out * Ch * 4)

    out = pl.pallas_call(
        functools.partial(_rpn_conv_head_kernel, wpad=wpad, cin=C),
        out_shape=jax.ShapeDtypeStruct((N, rows_out, Ch), jnp.float32),
        grid=(N,),
        in_specs=[
            pl.BlockSpec((None, rows_in, C), lambda n: (n, 0, 0)),
            pl.BlockSpec((9 * C, RC), lambda n: (0, 0)),
            pl.BlockSpec((1, RC), lambda n: (0, 0)),
            pl.BlockSpec((RC, Ch), lambda n: (0, 0)),
            pl.BlockSpec((1, Ch), lambda n: (0, 0)),
        ],
        out_specs=pl.BlockSpec((None, rows_out, Ch), lambda n: (n, 0, 0)),
        compiler_params=_compiler_params(("parallel",)),
        cost_estimate=cost,
    )(xs, conv_wmat.astype(jnp.bfloat16), bc,
      head_wmat.astype(jnp.bfloat16), bh)

    return out.reshape(N, H, wpad, Ch)[:, :, :W, :]      # drop overrun cols


# ----------------------------------------------------------------------------
# Pallas kernel 3: fused ROI head  pool -> fc7 (ReLU) -> [cls | reg].
# ----------------------------------------------------------------------------
def _roi_head_kernel(x_ref, w1_ref, b1_ref, w2_ref, b2_ref, o_ref):
    fc7 = jnp.dot(x_ref[...], w1_ref[...], preferred_element_type=jnp.float32)
    fc7 = jnp.maximum(fc7 + b1_ref[...], 0.0).astype(jnp.bfloat16)
    out = jnp.dot(fc7, w2_ref[...], preferred_element_type=jnp.float32)
    o_ref[...] = (out + b2_ref[...]).astype(o_ref.dtype)


def pallas_roi_head(pool, w1, b1, w2, b2, out_dtype=jnp.float32):
    """One kernel: both weight matrices VMEM-resident, no fc7 HBM round-trip."""
    # TODO(synk): K-tile w1 for very large pooled feature dims.
    M, K1 = pool.shape
    F7 = w1.shape[1]
    Co = w2.shape[1]
    x = pool.astype(jnp.bfloat16)
    if M <= 1024:
        tm = M
    else:
        tm = 256
        x = _pad_axis(x, 0, tm)
    Mp = x.shape[0]

    cost = pl.CostEstimate(
        flops=2 * Mp * (K1 * F7 + F7 * Co), transcendentals=0,
        bytes_accessed=2 * Mp * K1 + 2 * K1 * F7 + 2 * F7 * Co + 4 * Mp * Co)

    out = pl.pallas_call(
        _roi_head_kernel,
        out_shape=jax.ShapeDtypeStruct((Mp, Co), out_dtype),
        grid=(Mp // tm,),
        in_specs=[
            pl.BlockSpec((tm, K1), lambda i: (i, 0)),
            pl.BlockSpec((K1, F7), lambda i: (0, 0)),
            pl.BlockSpec((1, F7), lambda i: (0, 0)),
            pl.BlockSpec((F7, Co), lambda i: (0, 0)),
            pl.BlockSpec((1, Co), lambda i: (0, 0)),
        ],
        out_specs=pl.BlockSpec((tm, Co), lambda i: (i, 0)),
        compiler_params=_compiler_params(("parallel",)),
        cost_estimate=cost,
    )(x, w1.astype(jnp.bfloat16), b1.reshape(1, F7).astype(jnp.float32),
      w2.astype(jnp.bfloat16), b2.reshape(1, Co).astype(jnp.float32))
    return out[:M] if Mp != M else out


# ----------------------------------------------------------------------------
# Anchors / proposal decoding / NMS (plain-JAX glue) + matmul-based RoIAlign.
# ----------------------------------------------------------------------------
BBOX_XFORM_CLIP = math.log(1000.0 / 16.0)


def generate_anchors(fh, fw, stride, radios, scales):
    base = []
    for s in scales:
        for r in radios:
            size = stride * s
            w = size * (1.0 / r) ** 0.5
            h = size * r ** 0.5
            base.append([-w / 2.0, -h / 2.0, w / 2.0, h / 2.0])
    base = jnp.asarray(base, jnp.float32)                          # (A, 4)
    ys = (jnp.arange(fh, dtype=jnp.float32) + 0.5) * stride
    xs = (jnp.arange(fw, dtype=jnp.float32) + 0.5) * stride
    gy, gx = jnp.meshgrid(ys, xs, indexing="ij")
    shifts = jnp.stack([gx.ravel(), gy.ravel(), gx.ravel(), gy.ravel()], axis=1)
    return (shifts[:, None, :] + base[None, :, :]).reshape(-1, 4)


def _decode_boxes(anchors, deltas):
    wa = anchors[:, 2] - anchors[:, 0]
    ha = anchors[:, 3] - anchors[:, 1]
    cxa = anchors[:, 0] + 0.5 * wa
    cya = anchors[:, 1] + 0.5 * ha
    dx, dy = deltas[:, 0], deltas[:, 1]
    dw = jnp.clip(deltas[:, 2], -BBOX_XFORM_CLIP, BBOX_XFORM_CLIP)
    dh = jnp.clip(deltas[:, 3], -BBOX_XFORM_CLIP, BBOX_XFORM_CLIP)
    cx = dx * wa + cxa
    cy = dy * ha + cya
    w = jnp.exp(dw) * wa
    h = jnp.exp(dh) * ha
    return jnp.stack([cx - 0.5 * w, cy - 0.5 * h, cx + 0.5 * w, cy + 0.5 * h], 1)


def _clip_boxes(boxes, img_h, img_w):
    x1 = jnp.clip(boxes[:, 0], 0.0, img_w)
    y1 = jnp.clip(boxes[:, 1], 0.0, img_h)
    x2 = jnp.clip(boxes[:, 2], 0.0, img_w)
    y2 = jnp.clip(boxes[:, 3], 0.0, img_h)
    return jnp.stack([x1, y1, x2, y2], axis=1)


def _pairwise_iou(a, b):
    area_a = jnp.maximum(a[:, 2] - a[:, 0], 0) * jnp.maximum(a[:, 3] - a[:, 1], 0)
    area_b = jnp.maximum(b[:, 2] - b[:, 0], 0) * jnp.maximum(b[:, 3] - b[:, 1], 0)
    lt = jnp.maximum(a[:, None, :2], b[None, :, :2])
    rb = jnp.minimum(a[:, None, 2:], b[None, :, 2:])
    wh = jnp.maximum(rb - lt, 0.0)
    inter = wh[..., 0] * wh[..., 1]
    union = area_a[:, None] + area_b[None, :] - inter
    return inter / jnp.maximum(union, 1e-8)


def _nms_fixed(boxes, nms_thresh, keep_n):
    # boxes already sorted by descending score.
    n = boxes.shape[0]
    iou = _pairwise_iou(boxes, boxes)

    def body(i, keep):
        suppress = (iou[i] > nms_thresh) & (jnp.arange(n) > i) & keep[i]
        return keep & ~suppress

    keep = lax.fori_loop(0, n, body, jnp.ones((n,), bool))
    order = jnp.argsort(~keep)          # stable: kept boxes first, score order
    return boxes[order[:keep_n]]


def compute_proposals(rpn_score_nhwc, rpn_delta_nhwc, anchors, score_top_n,
                      nms_top_n, nms_thresh, image_hw):
    # TODO(synk): top-k / greedy NMS is sequential data-dependent control flow;
    # kept in plain JAX rather than a Pallas kernel.
    N = rpn_score_nhwc.shape[0]
    img_h, img_w = image_hw
    # NHWC slabs flatten directly into anchor order (h, w, a) -- no transpose.
    scores = jax.nn.sigmoid(rpn_score_nhwc.reshape(N, -1).astype(jnp.float32))
    deltas = rpn_delta_nhwc.reshape(N, -1, 4).astype(jnp.float32)

    def per_image(sc, dl):
        props = _clip_boxes(_decode_boxes(anchors, dl), img_h, img_w)
        _, idx = lax.top_k(sc, score_top_n)
        return _nms_fixed(props[idx], nms_thresh, nms_top_n)

    return jax.vmap(per_image)(scores, deltas)          # (N, nms_top_n, 4)


def _interp_matrix(lo, hi, out_size, in_size):
    step = (hi - lo) / out_size
    centers = lo + (jnp.arange(out_size, dtype=jnp.float32) + 0.5) * step
    centers = jnp.clip(centers, 0.0, in_size - 1.0)
    grid = jnp.arange(in_size, dtype=jnp.float32)
    return jnp.maximum(0.0, 1.0 - jnp.abs(centers[:, None] - grid[None, :]))


def roi_align(feature_nhwc, rois, out_size, spatial_scale):
    """Bilinear RoIAlign as two batched interpolation-matrix contractions per
    image (gather-free, bf16 operands, f32 accumulation, MXU-friendly).

    TODO(synk): pools each bin with a triangular kernel instead of
    torchvision's fixed sampling points; numerics differ slightly.
    """
    N, H, W, C = feature_nhwc.shape
    R = rois.shape[1]
    P = out_size
    feat_bf16 = feature_nhwc.astype(jnp.bfloat16)

    def per_image(feat, rois_i):
        x1, y1, x2, y2 = [rois_i[:, k] * spatial_scale for k in range(4)]
        ky = jax.vmap(lambda a, b: _interp_matrix(a, b, P, H))(y1, y2)  # (R,P,H)
        kx = jax.vmap(lambda a, b: _interp_matrix(a, b, P, W))(x1, x2)  # (R,P,W)
        tmp = jnp.dot(ky.reshape(R * P, H).astype(jnp.bfloat16),
                      feat.reshape(H, W * C),
                      preferred_element_type=jnp.float32)               # (R*P, W*C)
        tmp = tmp.reshape(R, P, W, C).astype(jnp.bfloat16)
        out = jnp.einsum("rqw,rpwc->rpqc", kx.astype(jnp.bfloat16), tmp,
                         preferred_element_type=jnp.float32)            # (R,P,P,C)
        return out.reshape(R, P * P * C)

    pooled = jax.vmap(per_image)(feat_bf16, rois)
    return pooled.reshape(N * R, P * P * C)              # lane-dense rows


# ----------------------------------------------------------------------------
# Parameter init (deterministic, synthetic) and the RCNN module.
# ----------------------------------------------------------------------------
def init_params(key, cfg):
    ks = jax.random.split(key, 8)

    def w(k, shape, scale=0.05):
        return scale * jax.random.normal(k, shape, jnp.float32)

    C = cfg["num_feature_channel"]
    RC = cfg["num_rpn_channel"]
    A = cfg["num_anchor"]
    P = cfg["pool_out_size"]
    F7 = cfg["num_fc7_channel"]
    NC = cfg["num_class"]
    return {
        # feature_extractor: one 3x3 conv, stride = feature_stride, ReLU
        "feat_w": w(ks[0], (C, 3, 3, 3)),
        "feat_b": jnp.zeros((C,), jnp.float32),
        # RPN: 3x3 conv + ReLU, then 1x1 score / delta convs
        "rpn_conv_w": w(ks[1], (RC, C, 3, 3)),
        "rpn_conv_b": jnp.zeros((RC,), jnp.float32),
        "rpn_score_w": w(ks[2], (A, RC, 1, 1)),
        "rpn_score_b": jnp.zeros((A,), jnp.float32),
        "rpn_delta_w": w(ks[3], (A * 4, RC, 1, 1)),
        "rpn_delta_b": jnp.zeros((A * 4,), jnp.float32),
        # conv_to_head: flatten(pool, NHWC order) -> fc7, ReLU
        "head_w": w(ks[4], (P * P * C, F7)),
        "head_b": jnp.zeros((F7,), jnp.float32),
        # classification / regression heads (nn.Linear)
        "cls_w": w(ks[5], (F7, NC)),
        "cls_b": jnp.zeros((NC,), jnp.float32),
        "reg_w": w(ks[6], (F7, NC * 4)),
        "reg_b": jnp.zeros((NC * 4,), jnp.float32),
    }


class RCNN:
    def __init__(self, params, config):
        self.params = params
        self.cfg = config
        self.mode = "test"
        self.anchors = None
        self._anchor_hw = None
        self.rois_list = None
        self.prep = self._prepare(params, config)

    @staticmethod
    def _prepare(p, cfg):
        """Reshape / fuse / bf16-cast all matmul weights once at init."""
        A = cfg["num_anchor"]
        bf16 = jnp.bfloat16
        return {
            "feat_wm": _conv_w_mat(p["feat_w"]).astype(bf16),
            "feat_b": p["feat_b"],
            "rpn_conv_wm": _conv_w_mat(p["rpn_conv_w"]).astype(bf16),
            "rpn_conv_b": p["rpn_conv_b"],
            # fused 1x1 score + delta heads: (RC, A + 4A)
            "rpn_head_wm": jnp.concatenate(
                [p["rpn_score_w"].reshape(A, -1),
                 p["rpn_delta_w"].reshape(A * 4, -1)], axis=0).T.astype(bf16),
            "rpn_head_b": jnp.concatenate([p["rpn_score_b"], p["rpn_delta_b"]]),
            "head_wm": p["head_w"].astype(bf16),
            "head_b": p["head_b"],
            # fused classification + regression heads: (F7, NC + 4*NC)
            "cr_wm": jnp.concatenate([p["cls_w"], p["reg_w"]], axis=1).astype(bf16),
            "cr_b": jnp.concatenate([p["cls_b"], p["reg_b"]]),
        }

    def rpn_mode(self):
        self.mode = "rpn"

    def total_mode(self):
        self.mode = "total"

    def test_mode(self):
        self.mode = "test"

    def forward(self, image):
        prep, cfg = self.prep, self.cfg
        A, NC = cfg["num_anchor"], cfg["num_class"]

        # single layout conversion at the module boundary (NCHW -> NHWC)
        x = jnp.transpose(image, (0, 2, 3, 1))

        # backbone: 3x3 stride-s conv + ReLU -> bf16 NHWC feature slab
        feature = conv2d_im2col(x, prep["feat_wm"], prep["feat_b"], 3, 3,
                                cfg["feature_stride"], 1, relu=True,
                                out_dtype=jnp.bfloat16)
        fh, fw = feature.shape[1], feature.shape[2]
        # TODO(synk): anchor cache on `self` is a Python side effect and would
        # freeze under jax.jit of forward(); fine for eager execution here.
        if self.anchors is None or self._anchor_hw != (fh, fw):
            self.anchors = generate_anchors(fh, fw, cfg["feature_stride"],
                                            cfg["radios"], cfg["scales"])
            self._anchor_hw = (fh, fw)

        # RPN: 3x3 conv + ReLU + fused 1x1 score/delta heads in ONE kernel
        sd = rpn_conv_and_heads(feature, prep["rpn_conv_wm"],
                                prep["rpn_conv_b"], prep["rpn_head_wm"],
                                prep["rpn_head_b"])
        rpn_score = sd[..., :A]                        # (N, fh, fw, A)
        rpn_delta = sd[..., A:]                        # (N, fh, fw, 4A)
        if self.mode == "rpn":
            # match the PyTorch module's NCHW outputs in rpn mode
            return (jnp.transpose(rpn_score, (0, 3, 1, 2)),
                    jnp.transpose(rpn_delta, (0, 3, 1, 2)))

        rois = compute_proposals(rpn_score, rpn_delta, self.anchors,
                                 cfg["score_top_n"], cfg["nms_top_n"],
                                 cfg["nms_thresh"], image.shape[2:])
        if self.mode == "total":
            self.rois_list = rois

        # RoIAlign (batched bf16 matmul form) + fused fc7 / cls / reg heads
        pool = roi_align(feature, rois, cfg["pool_out_size"],
                         cfg["feature_compress"])
        out = pallas_roi_head(pool, prep["head_wm"], prep["head_b"],
                              prep["cr_wm"], prep["cr_b"])
        score = out[:, :NC]
        bbox = out[:, NC:].reshape(-1, NC, 4)
        return score, bbox


if __name__ == "__main__":
    config = {
        "feature_stride": 4,
        "feature_compress": 0.25,
        "num_feature_channel": 32,
        "num_fc7_channel": 64,
        "num_rpn_channel": 32,
        "num_anchor": 3,
        "score_top_n": 32,
        "nms_top_n": 8,
        "nms_thresh": 0.7,
        "pool_out_size": 4,
        "num_class": 5,
        "radios": [0.5, 1.0, 2.0],
        "scales": [2.0],
    }
    key = jax.random.PRNGKey(0)
    pkey, xkey = jax.random.split(key)
    params = init_params(pkey, config)
    image = jax.random.normal(xkey, (2, 3, 32, 32), jnp.float32)

    model = RCNN(params, config)
    score, bbox = model.forward(image)
    score, bbox = jax.block_until_ready((score, bbox))

    num_rois = image.shape[0] * config["nms_top_n"]
    assert score.shape == (num_rois, config["num_class"]), score.shape
    assert bbox.shape == (num_rois, config["num_class"], 4), bbox.shape
    assert bool(jnp.all(jnp.isfinite(score))) and bool(jnp.all(jnp.isfinite(bbox)))
    print("KERNEL_OK")
</pallas_src>

<mosaic_0001>
module attributes {stable_mosaic.version = 11 : i64} {
  func.func @_matmul_bias_kernel(%arg0: i32, %arg1: i32, %arg2: i32, %arg3: memref<128x27xbf16, #tpu.memory_space<vmem>>, %arg4: memref<27x32xbf16, #tpu.memory_space<vmem>>, %arg5: memref<1x32xf32, #tpu.memory_space<vmem>>, %arg6: memref<128x32xbf16, #tpu.memory_space<vmem>>, %arg7: memref<128x32xf32, #tpu.memory_space<vmem>>) attributes {dimension_semantics = [#tpu.dimension_semantics<parallel>, #tpu.dimension_semantics<parallel>, #tpu.dimension_semantics<arbitrary>], iteration_bounds = array<i64: 1, 1, 1>, scalar_prefetch = 0 : i64, scratch_operands = 1 : i64, tpu.core_type = #tpu.core_type<tc>, window_params = [{transform_indices = @transform_0, window_bounds = array<i64: 128, 27>}, {transform_indices = @transform_1, window_bounds = array<i64: 27, 32>}, {transform_indices = @transform_2, window_bounds = array<i64: 1, 32>}, {transform_indices = @transform_3, window_bounds = array<i64: 128, 32>}]} {
    %c0 = arith.constant 0 : index
    %c0_0 = arith.constant 0 : index
    %0 = vector.load %arg3[%c0, %c0_0] : memref<128x27xbf16, #tpu.memory_space<vmem>>, vector<128x27xbf16>
    %c0_1 = arith.constant 0 : index
    %c0_2 = arith.constant 0 : index
    %1 = vector.load %arg4[%c0_1, %c0_2] : memref<27x32xbf16, #tpu.memory_space<vmem>>, vector<27x32xbf16>
    %cst = arith.constant dense<0.000000e+00> : vector<128x32xf32>
    %2 = tpu.matmul %0, %1, %cst {dimension_numbers = #tpu.dot_dimension_numbers<[1], [0], [0], [1], [0, 0, 1, 1], [], []>} : vector<128x27xbf16>, vector<27x32xbf16>, vector<128x32xf32> -> vector<128x32xf32>
    %c0_i32 = arith.constant 0 : i32
    %3 = arith.cmpi eq, %arg2, %c0_i32 : i32
    %4 = arith.extui %3 : i1 to i32
    %c0_i32_3 = arith.constant 0 : i32
    %5 = arith.cmpi ne, %4, %c0_i32_3 : i32
    scf.if %5 {
      %c0_8 = arith.constant 0 : index
      %c0_9 = arith.constant 0 : index
      %12 = vector.load %arg7[%c0_8, %c0_9] : memref<128x32xf32, #tpu.memory_space<vmem>>, vector<128x32xf32>
      tpu.vector_store %arg7[%c0_8, %c0_9], %2 {strides = array<i32>} : memref<128x32xf32, #tpu.memory_space<vmem>>, vector<128x32xf32>,
    } else {
    }
    %c0_i32_4 = arith.constant 0 : i32
    %6 = arith.cmpi sgt, %arg2, %c0_i32_4 : i32
    %7 = arith.extui %6 : i1 to i32
    %c0_i32_5 = arith.constant 0 : i32
    %8 = arith.cmpi ne, %7, %c0_i32_5 : i32
    scf.if %8 {
      %c0_8 = arith.constant 0 : index
      %c0_9 = arith.constant 0 : index
      %12 = vector.load %arg7[%c0_8, %c0_9] : memref<128x32xf32, #tpu.memory_space<vmem>>, vector<128x32xf32>
      %13 = arith.addf %12, %2 : vector<128x32xf32>
      %c0_10 = arith.constant 0 : index
      %c0_11 = arith.constant 0 : index
      %14 = vector.load %arg7[%c0_10, %c0_11] : memref<128x32xf32, #tpu.memory_space<vmem>>, vector<128x32xf32>
      tpu.vector_store %arg7[%c0_10, %c0_11], %13 {strides = array<i32>} : memref<128x32xf32, #tpu.memory_space<vmem>>, vector<128x32xf32>,
    } else {
    }
    %c0_i32_6 = arith.constant 0 : i32
    %9 = arith.cmpi eq, %arg2, %c0_i32_6 : i32
    %10 = arith.extui %9 : i1 to i32
    %c0_i32_7 = arith.constant 0 : i32
    %11 = arith.cmpi ne, %10, %c0_i32_7 : i32
    scf.if %11 {
      %c0_8 = arith.constant 0 : index
      %c0_9 = arith.constant 0 : index
      %12 = vector.load %arg7[%c0_8, %c0_9] : memref<128x32xf32, #tpu.memory_space<vmem>>, vector<128x32xf32>
      %c0_10 = arith.constant 0 : index
      %c0_11 = arith.constant 0 : index
      %13 = vector.load %arg5[%c0_10, %c0_11] : memref<1x32xf32, #tpu.memory_space<vmem>>, vector<1x32xf32>
      %14 = vector.broadcast %13 : vector<1x32xf32> to vector<128x32xf32>
      %15 = arith.addf %12, %14 : vector<128x32xf32>
      %cst_12 = arith.constant 0.000000e+00 : f32
      %16 = vector.broadcast %cst_12 : f32 to vector<128x32xf32>
      %17 = arith.maximumf %15, %16 : vector<128x32xf32>
      %18 = arith.truncf %17 : vector<128x32xf32> to vector<128x32xbf16>
      %c0_13 = arith.constant 0 : index
      %c0_14 = arith.constant 0 : index
      %19 = vector.load %arg6[%c0_13, %c0_14] : memref<128x32xbf16, #tpu.memory_space<vmem>>, vector<128x32xbf16>
      tpu.vector_store %arg6[%c0_13, %c0_14], %18 {strides = array<i32>} : memref<128x32xbf16, #tpu.memory_space<vmem>>, vector<128x32xbf16>,
    } else {
    }
    return
  }
  func.func @transform_0(%arg0: i32, %arg1: i32, %arg2: i32) -> (i32, i32) {
    %c0_i32 = arith.constant 0 : i32
    return %arg0, %arg2 : i32, i32
  }
  func.func @transform_1(%arg0: i32, %arg1: i32, %arg2: i32) -> (i32, i32) {
    %c0_i32 = arith.constant 0 : i32
    return %arg2, %arg1 : i32, i32
  }
  func.func @transform_2(%arg0: i32, %arg1: i32, %arg2: i32) -> (i32, i32) {
    %c0_i32 = arith.constant 0 : i32
    %c0_i32_0 = arith.constant 0 : i32
    return %c0_i32, %arg1 : i32, i32
  }
  func.func @transform_3(%arg0: i32, %arg1: i32, %arg2: i32) -> (i32, i32) {
    %c0_i32 = arith.constant 0 : i32
    return %arg0, %arg1 : i32, i32
  }
}

</mosaic_0001>

<bundles_post_ra>
// kernel: tpu_custom_call.1
= control target key start
LH: loop header
LB: loop body
LE: loop exit
PB: predicated region body
PF: predicated region fallthrough
CT: control target
= control target key end

     0   :  { %vm111_vm0 = vcmask 1044480   ;;  %vm112_vm1 = vcmask 1045504   ;;  %v399_v2 = vmov 65535   ;;  %vm86_vm2 = vcmask 220160   ;;  %s562_s1 = inlined_call_operand.vmem [shape: bf16[27,32], index: 1, kind: input, shape index: {}]   ;;  %s563_s2 = inlined_call_operand.vmem [shape: f32[1,32], index: 2, kind: input, shape index: {}]   ;;  %s564_s0 = inlined_call_operand.vmem [shape: bf16[128,27], index: 0, kind: input, shape index: {}]   ;;  %s565_s3 = inlined_call_operand.vmem [shape: bf16[128,32], index: 3, kind: output, shape index: {}]  }
   0x1   :  { %v371_v0 = vld [vmem:[%s562_s1 + $0x8] sm:$0xf]  ;;  %v390_v1 = vld [vmem:[%s562_s1 + $0x8] sm:$0x30]  ;;  %v113_v3 = vsel %vm111_vm0, 4294967295, %v399_v2  ;;  %v389_v7 = vld [vmem:[%s562_s1] sm:$0xff] }
   0x2   :  { %v372_v4 = vor.u32 %v390_v1, %v371_v0  ;;  %v114_v5 = vsel %vm112_vm1, %v113_v3, 0  ;;  %v381_v8 = vld [vmem:[%s564_s0] sm:$0xff]  ;;  %v383_v9 = vld [vmem:[%s564_s0 + $0x10] sm:$0xff]  ;;  %v382_v12 = vld [vmem:[%s564_s0 + $0x8] sm:$0xff]  ;;  %vm171_vm3 = vcmask 261120   ;;  %vm312_vm4 = vcmask 257024  }
   0x3   :  { %v385_v10 = vld [vmem:[%s564_s0 + $0x20] sm:$0xff]  ;;  %v387_v11 = vld [vmem:[%s564_s0 + $0x30] sm:$0xff]  ;;  %v384_v13 = vld [vmem:[%s564_s0 + $0x18] sm:$0xff] }
   0x4   :  { %v116_v6 = vand.u32 %v372_v4, %v114_v5  ;;  %v386_v14 = vld [vmem:[%s564_s0 + $0x28] sm:$0xff]  ;;  %v388_v15 = vld [vmem:[%s564_s0 + $0x38] sm:$0xff]  ;;  %v466_v18 = vld [vmem:[%s563_s2] ss:$0 sm:$0xff] }
   0x6   :  { %124 = vmatpush.bf16.msra.mxu0 %v116_v6  ;;  %391 = vmatpush.bf16.msra.mxu1 %v116_v6 }
   0x7   :  { %392 = vmatpush.bf16.msra.mxu2 %v116_v6  ;;  %393 = vmatpush.bf16.msra.mxu3 %v116_v6 }
   0xa   :  { %125 = vmatpush.bf16.msra.mxu0 %v389_v7  ;;  %394 = vmatpush.bf16.msra.mxu1 %v389_v7 }
   0xb   :  { %395 = vmatpush.bf16.msra.mxu2 %v389_v7  ;;  %396 = vmatpush.bf16.msra.mxu3 %v389_v7 }
   0xd   :  { %373 = vmatmul.msk.bf16.vlgmr.msra.gmra.mxu0 %vm86_vm2, %v381_v8  ;;  %375 = vmatmul.msk.bf16.vlgmr.msra.gmra.mxu1 %vm86_vm2, %v383_v9 }
   0xe   :  { %377 = vmatmul.msk.bf16.vlgmr.msra.gmra.mxu2 %vm86_vm2, %v385_v10  ;;  %379 = vmatmul.msk.bf16.vlgmr.msra.gmra.mxu3 %vm86_vm2, %v387_v11 }
  0x1d   :  { %374 = vmatmul.msk.bf16.gmra.mxu0 %vm86_vm2, %v382_v12  ;;  %376 = vmatmul.msk.bf16.gmra.mxu1 %vm86_vm2, %v384_v13 }
  0x1e   :  { %378 = vmatmul.msk.bf16.gmra.mxu2 %vm86_vm2, %v386_v14  ;;  %380 = vmatmul.msk.bf16.gmra.mxu3 %vm86_vm2, %v388_v15 }
  0x8a   :  { %v127_v16 = vpop.f32.mrf.mxu0  ;;  %v137_v17 = vpop.f32.mrf.mxu1 }
  0x8b   :  { %172 = vst.msk [vmem:[#allocation2] sm:$0xff] %vm171_vm3, %v127_v16 }
  0x8c   :  { %176 = vst.msk [vmem:[#allocation2 + $0x20] sm:$0xff] %vm171_vm3, %v137_v17 }
  0x91   :  { %v147_v19 = vpop.f32.mrf.mxu2  ;;  %v157_v20 = vpop.f32.mrf.mxu3 }
  0x92   :  { %v244_v21 = vld [vmem:[#allocation2] sm:$0xff]  ;;  %180 = vst.msk [vmem:[#allocation2 + $0x40] sm:$0xff] %vm171_vm3, %v147_v19  ;;  %v129_v22 = vpop.f32.mrf.mxu0  ;;  %v139_v23 = vpop.f32.mrf.mxu1 }
  0x93   :  { %v264_v24 = vadd.f32 %v466_v18, %v244_v21  ;;  %v248_v25 = vld [vmem:[#allocation2 + $0x20] sm:$0xff]  ;;  %184 = vst.msk [vmem:[#allocation2 + $0x60] sm:$0xff] %vm171_vm3, %v157_v20 }
  0x94   :  { %v268_v26 = vadd.f32 %v466_v18, %v248_v25  ;;  %173 = vst.msk [vmem:[#allocation2 + $0x8] sm:$0xff] %vm171_vm3, %v129_v22 }
  0x95   :  { %v280_v27 = vmax.f32 %v264_v24, 0.0  ;;  %177 = vst.msk [vmem:[#allocation2 + $0x28] sm:$0xff] %vm171_vm3, %v139_v23 }
  0x96   :  { %v284_v28 = vmax.f32 %v268_v26, 0.0 }
  0x97   :  { %v296_v29 = vpack.c.bf16 %v280_v27, %v280_v27 }
  0x98   :  { %v300_v30 = vpack.c.bf16 %v284_v28, %v284_v28 }
  0x99   :  { %313 = vst.msk [vmem:[%s565_s3] sm:$0xf] %vm312_vm4, %v296_v29  ;;  %v252_v31 = vld [vmem:[#allocation2 + $0x40] sm:$0xff]  ;;  %v149_v32 = vpop.f32.mrf.mxu2  ;;  %v159_v33 = vpop.f32.mrf.mxu3 }
  0x9a   :  { %317 = vst.msk [vmem:[%s565_s3 + $0x10] sm:$0xf] %vm312_vm4, %v300_v30  ;;  %v272_v34 = vadd.f32 %v466_v18, %v252_v31  ;;  %v256_v35 = vld [vmem:[#allocation2 + $0x60] sm:$0xff]  ;;  %v132_v36 = vpop.f32.mrf.mxu0  ;;  %v142_v37 = vpop.f32.mrf.mxu1 }
  0x9b   :  { %v276_v38 = vadd.f32 %v466_v18, %v256_v35  ;;  %v245_v39 = vld [vmem:[#allocation2 + $0x8] sm:$0xff]  ;;  %181 = vst.msk [vmem:[#allocation2 + $0x48] sm:$0xff] %vm171_vm3, %v149_v32 }
  0x9c   :  { %v288_v40 = vmax.f32 %v272_v34, 0.0  ;;  %v265_v41 = vadd.f32 %v466_v18, %v245_v39  ;;  %v249_v42 = vld [vmem:[#allocation2 + $0x28] sm:$0xff]  ;;  %185 = vst.msk [vmem:[#allocation2 + $0x68] sm:$0xff] %vm171_vm3, %v159_v33 }
  0x9d   :  { %v292_v43 = vmax.f32 %v276_v38, 0.0  ;;  %v269_v44 = vadd.f32 %v466_v18, %v249_v42  ;;  %174 = vst.msk [vmem:[#allocation2 + $0x10] sm:$0xff] %vm171_vm3, %v132_v36 }
  0x9e   :  { %v304_v45 = vpack.c.bf16 %v288_v40, %v288_v40  ;;  %v281_v46 = vmax.f32 %v265_v41, 0.0  ;;  %178 = vst.msk [vmem:[#allocation2 + $0x30] sm:$0xff] %vm171_vm3, %v142_v37 }
  0x9f   :  { %v308_v47 = vpack.c.bf16 %v292_v43, %v292_v43  ;;  %v285_v48 = vmax.f32 %v269_v44, 0.0 }
  0xa0   :  { %321 = vst.msk [vmem:[%s565_s3 + $0x20] sm:$0xf] %vm312_vm4, %v304_v45  ;;  %v297_v49 = vpack.c.bf16 %v281_v46, %v281_v46 }
  0xa1   :  { %325 = vst.msk [vmem:[%s565_s3 + $0x30] sm:$0xf] %vm312_vm4, %v308_v47  ;;  %v301_v50 = vpack.c.bf16 %v285_v48, %v285_v48  ;;  %v152_v51 = vpop.f32.mrf.mxu2  ;;  %v162_v52 = vpop.f32.mrf.mxu3 }
  0xa2   :  { %314 = vst.msk [vmem:[%s565_s3 + $0x4] sm:$0xf] %vm312_vm4, %v297_v49  ;;  %v253_v53 = vld [vmem:[#allocation2 + $0x48] sm:$0xff]  ;;  %v134_v56 = vpop.f32.mrf.mxu0  ;;  %v144_v59 = vpop.f32.mrf.mxu1 }
  0xa3   :  { %318 = vst.msk [vmem:[%s565_s3 + $0x14] sm:$0xf] %vm312_vm4, %v301_v50  ;;  %v273_v54 = vadd.f32 %v466_v18, %v253_v53  ;;  %v257_v55 = vld [vmem:[#allocation2 + $0x68] sm:$0xff] }
  0xa4   :  { %v277_v57 = vadd.f32 %v466_v18, %v257_v55  ;;  %v246_v58 = vld [vmem:[#allocation2 + $0x10] sm:$0xff]  ;;  %182 = vst.msk [vmem:[#allocation2 + $0x50] sm:$0xff] %vm171_vm3, %v152_v51 }
  0xa5   :  { %v289_v60 = vmax.f32 %v273_v54, 0.0  ;;  %v266_v61 = vadd.f32 %v466_v18, %v246_v58  ;;  %v250_v62 = vld [vmem:[#allocation2 + $0x30] sm:$0xff]  ;;  %186 = vst.msk [vmem:[#allocation2 + $0x70] sm:$0xff] %vm171_vm3, %v162_v52 }
  0xa6   :  { %v293_v63 = vmax.f32 %v277_v57, 0.0  ;;  %v270_v0 = vadd.f32 %v466_v18, %v250_v62  ;;  %175 = vst.msk [vmem:[#allocation2 + $0x18] sm:$0xff] %vm171_vm3, %v134_v56 }
  0xa7   :  { %v305_v1 = vpack.c.bf16 %v289_v60, %v289_v60  ;;  %v282_v2 = vmax.f32 %v266_v61, 0.0  ;;  %179 = vst.msk [vmem:[#allocation2 + $0x38] sm:$0xff] %vm171_vm3, %v144_v59 }
  0xa8   :  { %v309_v3 = vpack.c.bf16 %v293_v63, %v293_v63  ;;  %v286_v4 = vmax.f32 %v270_v0, 0.0 }
  0xa9   :  { %322 = vst.msk [vmem:[%s565_s3 + $0x24] sm:$0xf] %vm312_vm4, %v305_v1  ;;  %v298_v5 = vpack.c.bf16 %v282_v2, %v282_v2  ;;  %v154_v7 = vpop.f32.mrf.mxu2  ;;  %v164_v9 = vpop.f32.mrf.mxu3 }
  0xaa   :  { %326 = vst.msk [vmem:[%s565_s3 + $0x34] sm:$0xf] %vm312_vm4, %v309_v3  ;;  %v302_v6 = vpack.c.bf16 %v286_v4, %v286_v4 }
  0xab   :  { %315 = vst.msk [vmem:[%s565_s3 + $0x8] sm:$0xf] %vm312_vm4, %v298_v5  ;;  %v254_v8 = vld [vmem:[#allocation2 + $0x50] sm:$0xff] }
  0xac   :  { %319 = vst.msk [vmem:[%s565_s3 + $0x18] sm:$0xf] %vm312_vm4, %v302_v6  ;;  %v274_v10 = vadd.f32 %v466_v18, %v254_v8  ;;  %v258_v11 = vld [vmem:[#allocation2 + $0x70] sm:$0xff] }
  0xad   :  { %v278_v12 = vadd.f32 %v466_v18, %v258_v11  ;;  %v247_v13 = vld [vmem:[#allocation2 + $0x18] sm:$0xff]  ;;  %183 = vst.msk [vmem:[#allocation2 + $0x58] sm:$0xff] %vm171_vm3, %v154_v7 }
  0xae   :  { %v290_v14 = vmax.f32 %v274_v10, 0.0  ;;  %v267_v15 = vadd.f32 %v466_v18, %v247_v13  ;;  %v251_v16 = vld [vmem:[#allocation2 + $0x38] sm:$0xff]  ;;  %187 = vst.msk [vmem:[#allocation2 + $0x78] sm:$0xff] %vm171_vm3, %v164_v9 }
  0xaf   :  { %v294_v17 = vmax.f32 %v278_v12, 0.0  ;;  %v271_v19 = vadd.f32 %v466_v18, %v251_v16 }
  0xb0   :  { %v306_v20 = vpack.c.bf16 %v290_v14, %v290_v14  ;;  %v283_v21 = vmax.f32 %v267_v15, 0.0 }
  0xb1   :  { %v310_v22 = vpack.c.bf16 %v294_v17, %v294_v17  ;;  %v287_v23 = vmax.f32 %v271_v19, 0.0 }
  0xb2   :  { %323 = vst.msk [vmem:[%s565_s3 + $0x28] sm:$0xf] %vm312_vm4, %v306_v20  ;;  %v299_v24 = vpack.c.bf16 %v283_v21, %v283_v21 }
  0xb3   :  { %327 = vst.msk [vmem:[%s565_s3 + $0x38] sm:$0xf] %vm312_vm4, %v310_v22  ;;  %v303_v25 = vpack.c.bf16 %v287_v23, %v287_v23 }
  0xb4   :  { %316 = vst.msk [vmem:[%s565_s3 + $0xc] sm:$0xf] %vm312_vm4, %v299_v24  ;;  %v255_v26 = vld [vmem:[#allocation2 + $0x58] sm:$0xff] }
  0xb5   :  { %320 = vst.msk [vmem:[%s565_s3 + $0x1c] sm:$0xf] %vm312_vm4, %v303_v25  ;;  %v275_v27 = vadd.f32 %v466_v18, %v255_v26  ;;  %v259_v28 = vld [vmem:[#allocation2 + $0x78] sm:$0xff] }
  0xb6   :  { %v279_v29 = vadd.f32 %v466_v18, %v259_v28 }
  0xb7   :  { %v291_v30 = vmax.f32 %v275_v27, 0.0 }
  0xb8   :  { %v295_v31 = vmax.f32 %v279_v29, 0.0 }
  0xb9   :  { %v307_v32 = vpack.c.bf16 %v291_v30, %v291_v30 }
  0xba   :  { %v311_v33 = vpack.c.bf16 %v295_v31, %v295_v31 }
  0xbb   :  { %324 = vst.msk [vmem:[%s565_s3 + $0x2c] sm:$0xf] %vm312_vm4, %v307_v32 }
  0xbc   :  { %328 = vst.msk [vmem:[%s565_s3 + $0x3c] sm:$0xf] %vm312_vm4, %v311_v33 }

</bundles_post_ra>
